<compile_context>
chip_gen: v5e
topology: v5e:2x2
jax: 0.10.0
libtpu: 0.0.40
codegen_flags: <defaults>
</compile_context>

<pallas_src>
import functools
import math

import jax
import jax.numpy as jnp
from jax import lax
from jax.experimental import pallas as pl
from jax.experimental.pallas import tpu as pltpu

_LANE = 128
_SUBLANE = {4: 8, 2: 16, 1: 32}  # sublane packing by dtype byte-width


def _rmsnorm_kernel(x_ref, g_ref, o_ref, *, scale, eps):
    # x_ref: (tile_rows, dim_p), g_ref: (1, dim_p), o_ref: (tile_rows, dim_p)
    xf = x_ref[...].astype(jnp.float32)
    gamma = g_ref[...].astype(jnp.float32)               # broadcasts over rows

    # L2 norm over the last (feature) axis, matching F.normalize(dim=-1).
    # max(||x||, eps) == sqrt(max(sum(x^2), eps^2)): clamp before the rsqrt
    # and fold sqrt(dim) into the per-row (tile_rows, 1) reciprocal so the
    # per-element path is only two VPU multiplies.
    sq_sum = jnp.sum(xf * xf, axis=-1, keepdims=True)    # (tile_rows, 1) f32
    inv = lax.rsqrt(jnp.maximum(sq_sum, eps * eps)) * scale

    o_ref[...] = (xf * inv * gamma).astype(o_ref.dtype)


def rmsnorm(x, gamma, *, tile_rows=None, eps=1e-12,
            vmem_limit_bytes=48 * 1024 * 1024):
    """RMSNorm over the last axis of x. x: (..., dim), gamma: (dim,)."""
    orig_shape = x.shape
    dim = orig_shape[-1]
    scale = float(dim) ** 0.5

    rows = math.prod(orig_shape[:-1]) if len(orig_shape) > 1 else 1
    x2d = x.reshape(rows, dim)

    # Lane-dense feature axis: pad dim up to a multiple of 128.  Zero lanes do
    # not change the per-row norm; padded output lanes are sliced off below.
    dim_p = pl.cdiv(dim, _LANE) * _LANE
    g1d = gamma
    if dim_p != dim:
        x2d = jnp.pad(x2d, ((0, 0), (0, dim_p - dim)))
        g1d = jnp.pad(gamma, (0, dim_p - dim))
    g2d = g1d.reshape(1, dim_p)

    dtype_bytes = jnp.dtype(x.dtype).itemsize
    sub = _SUBLANE.get(dtype_bytes, 8)

    if tile_rows is None:
        # Working set per row: double-buffered input + output blocks
        # (2 * 2 * dtype_bytes) plus the in-kernel f32 temporary (4 bytes),
        # with ~2x headroom against the scoped VMEM limit.
        per_row_bytes = dim_p * (4 * dtype_bytes + 4)
        tile_rows = (vmem_limit_bytes // 2) // per_row_bytes
        tile_rows = min(1024, tile_rows)

    # Align to sublane packing and cap by the (sublane-rounded) row count.
    tile_rows = max(sub, (tile_rows // sub) * sub)
    tile_rows = min(tile_rows, pl.cdiv(rows, sub) * sub)

    grid = pl.cdiv(rows, tile_rows)
    rows_p = grid * tile_rows
    if rows_p != rows:
        # Padded rows are independent (zero rows -> zero output) and sliced off.
        x2d = jnp.pad(x2d, ((0, rows_p - rows), (0, 0)))

    kernel = functools.partial(_rmsnorm_kernel, scale=scale, eps=eps)

    out2d = pl.pallas_call(
        kernel,
        out_shape=jax.ShapeDtypeStruct((rows_p, dim_p), x.dtype),
        grid_spec=pl.GridSpec(
            grid=(grid,),
            in_specs=[
                pl.BlockSpec((tile_rows, dim_p), lambda i: (i, 0)),
                pl.BlockSpec((1, dim_p), lambda i: (0, 0)),   # gamma resident
            ],
            out_specs=pl.BlockSpec((tile_rows, dim_p), lambda i: (i, 0)),
        ),
        compiler_params=pltpu.CompilerParams(
            dimension_semantics=("parallel",),
            vmem_limit_bytes=vmem_limit_bytes,
        ),
    )(x2d, g2d)

    out2d = out2d[:rows, :dim]
    return out2d.reshape(orig_shape)


def _reference(x, gamma):
    x32 = x.astype(jnp.float32)
    norm = jnp.sqrt(jnp.sum(x32 * x32, axis=-1, keepdims=True))
    normed = x32 / jnp.maximum(norm, 1e-12)
    return (normed * (x.shape[-1] ** 0.5) * gamma.astype(jnp.float32)).astype(x.dtype)


if __name__ == "__main__":
    key = jax.random.PRNGKey(0)
    k1, k2 = jax.random.split(key)

    # Shape implied by the module: (batch, seq, dim), normalize over dim.
    batch, seq, dim = 2, 8, 32
    x = jax.random.normal(k1, (batch, seq, dim), dtype=jnp.float32)
    gamma = jnp.ones((dim,), dtype=jnp.float32)  # nn.Parameter(torch.ones(dim))

    out = jax.block_until_ready(rmsnorm(x, gamma))
    ref = _reference(x, gamma)
    assert out.shape == x.shape
    assert jnp.allclose(out, ref, atol=1e-5, rtol=1e-5), "f32 mismatch vs reference"

    # Awkward shapes (row count not a tile multiple, dim not a lane multiple)
    # in bf16 to exercise the padding paths.
    x2 = jax.random.normal(k2, (3, 5, 96), dtype=jnp.bfloat16)
    g2 = (1.0 + 0.01 * jnp.arange(96, dtype=jnp.float32)).astype(jnp.bfloat16)
    out2 = jax.block_until_ready(rmsnorm(x2, g2))
    ref2 = _reference(x2, g2)
    assert out2.shape == x2.shape
    assert jnp.allclose(out2.astype(jnp.float32), ref2.astype(jnp.float32),
                        atol=2e-2, rtol=2e-2), "bf16 mismatch vs reference"

    print("KERNEL_OK")
</pallas_src>

<mosaic_0001>
module attributes {stable_mosaic.version = 11 : i64} {
  func.func @_rmsnorm_kernel(%arg0: i32, %arg1: memref<16x128xf32, #tpu.memory_space<vmem>>, %arg2: memref<1x128xf32, #tpu.memory_space<vmem>>, %arg3: memref<16x128xf32, #tpu.memory_space<vmem>>) attributes {dimension_semantics = [#tpu.dimension_semantics<parallel>], iteration_bounds = array<i64: 1>, scalar_prefetch = 0 : i64, scratch_operands = 0 : i64, tpu.core_type = #tpu.core_type<tc>, window_params = [{transform_indices = @transform_0, window_bounds = array<i64: 16, 128>}, {pipeline_mode = #tpu.pipeline_mode<synchronous>, transform_indices = @transform_1, window_bounds = array<i64: 1, 128>}, {transform_indices = @transform_2, window_bounds = array<i64: 16, 128>}]} {
    %c0 = arith.constant 0 : index
    %c0_0 = arith.constant 0 : index
    %0 = vector.load %arg1[%c0, %c0_0] : memref<16x128xf32, #tpu.memory_space<vmem>>, vector<16x128xf32>
    %c0_1 = arith.constant 0 : index
    %c0_2 = arith.constant 0 : index
    %1 = vector.load %arg2[%c0_1, %c0_2] : memref<1x128xf32, #tpu.memory_space<vmem>>, vector<1x128xf32>
    %2 = arith.mulf %0, %0 : vector<16x128xf32>
    %cst = arith.constant dense<0.000000e+00> : vector<16xf32>
    %3 = vector.multi_reduction <add>, %2, %cst [1] : vector<16x128xf32> to vector<16xf32>
    %4 = vector.shape_cast %3 : vector<16xf32> to vector<16x1xf32>
    %cst_3 = arith.constant 1.000000e-24 : f32
    %5 = vector.broadcast %cst_3 : f32 to vector<16x1xf32>
    %6 = arith.maximumf %4, %5 : vector<16x1xf32>
    %7 = math.rsqrt %6 : vector<16x1xf32>
    %cst_4 = arith.constant 5.65685415 : f32
    %8 = vector.broadcast %cst_4 : f32 to vector<16x1xf32>
    %9 = arith.mulf %7, %8 : vector<16x1xf32>
    %10 = vector.broadcast %9 : vector<16x1xf32> to vector<16x128xf32>
    %11 = arith.mulf %0, %10 : vector<16x128xf32>
    %12 = vector.broadcast %1 : vector<1x128xf32> to vector<16x128xf32>
    %13 = arith.mulf %11, %12 : vector<16x128xf32>
    %c0_5 = arith.constant 0 : index
    %c0_6 = arith.constant 0 : index
    %14 = vector.load %arg3[%c0_5, %c0_6] : memref<16x128xf32, #tpu.memory_space<vmem>>, vector<16x128xf32>
    tpu.vector_store %arg3[%c0_5, %c0_6], %13 {strides = array<i32>} : memref<16x128xf32, #tpu.memory_space<vmem>>, vector<16x128xf32>,
    return
  }
  func.func @transform_0(%arg0: i32) -> (i32, i32) {
    %c0_i32 = arith.constant 0 : i32
    %c0_i32_0 = arith.constant 0 : i32
    return %arg0, %c0_i32 : i32, i32
  }
  func.func @transform_1(%arg0: i32) -> (i32, i32) {
    %c0_i32 = arith.constant 0 : i32
    %c0_i32_0 = arith.constant 0 : i32
    %c0_i32_1 = arith.constant 0 : i32
    return %c0_i32, %c0_i32_0 : i32, i32
  }
  func.func @transform_2(%arg0: i32) -> (i32, i32) {
    %c0_i32 = arith.constant 0 : i32
    %c0_i32_0 = arith.constant 0 : i32
    return %arg0, %c0_i32 : i32, i32
  }
}

</mosaic_0001>

<bundles_post_ra>
// kernel: tpu_custom_call.1
= control target key start
LH: loop header
LB: loop body
LE: loop exit
PB: predicated region body
PF: predicated region fallthrough
CT: control target
= control target key end

     0   :  { %7 = vsyncpa [#allocation3], 0  ;;  %s227_s0 = inlined_call_operand.hbm [shape: f32[16,128], index: 0, kind: input, shape index: {}]   ;;  %s228_s1 = inlined_call_operand.hbm [shape: f32[1,128], index: 1, kind: input, shape index: {}]   ;;  %s229_s2 = inlined_call_operand.hbm [shape: f32[16,128], index: 2, kind: output, shape index: {}]  }
   0x1   :  { %8 = vsyncpa [#allocation6], 0 }
   0x2   :  { %9 = vsyncpa [#allocation4], 0  ;;  %s14_s11 = sshll.u32 %s227_s0, 4  ;;  %s192_s12 = smov [#allocation2]   ;;  %s15_s11 = int_to_ptr.hbm [resolvable:$true] %s14_s11 }
   0x3   :  { %s16_s13 = sshll.u32 %s192_s12, 4  ;;  %s28_s16 = sshll.u32 %s228_s1, 4  ;;  %s17_s13 = int_to_ptr.vmem [resolvable:$true] %s16_s13  ;;  %s29_s16 = int_to_ptr.hbm [resolvable:$true] %s28_s16 }
   0x4   :  { %s193_s17 = smov 128   ;;  %s194_s18 = smov 8  }
   0x5   :  { %22 = dma.hbm_to_vmem [thread:$0]  %s15_s11, 256, %s17_s13, [#allocation3], %s193_s17, %s193_s17, %s194_s18  }
   0x6   :  { %s195_s19 = smov [#allocation5]  }
   0x7   :  { %s30_s20 = sshll.u32 %s195_s19, 4  ;;  %s31_s20 = int_to_ptr.vmem [resolvable:$true] %s30_s20 }
   0x8   :  { %33 = dma.hbm_to_vmem [thread:$0]  %s29_s16, 16, %s31_s20, [#allocation6]  }
   0x9   :  { %186 = dma.done.wait [#allocation3], 256  }
   0xa   :  { %187 = vsyncadd [#allocation3], 4294967040 }
   0xb   :  { %188 = dma.done.wait [#allocation6], 16  }
   0xc   :  { %189 = vsyncadd [#allocation6], 4294967280  ;;  %v42_v0 = vld [vmem:[#allocation2] sm:$0xff]  ;;  %v43_v2 = vld [vmem:[#allocation2 + $0x8] sm:$0xff]  ;;  %s196_s0 = smov [#allocation7]   ;;  %s90_s23 = sshll.u32 %s229_s2, 4  ;;  %s91_s23 = int_to_ptr.hbm [resolvable:$true] %s90_s23 }
   0xd   :  { %v45_v1 = vmul.f32 %v42_v0, %v42_v0  ;;  %v46_v3 = vmul.f32 %v43_v2, %v43_v2  ;;  %v109_v19 = vld [vmem:[#allocation5] ss:$0 sm:$0xff]  ;;  %s88_s1 = sshll.u32 %s196_s0, 4  ;;  %s89_s1 = int_to_ptr.vmem [resolvable:$true] %s88_s1 }
   0xf   :  { %47 = vadd.xlane.f32.xlu0 %v45_v1 }
  0x17   :  { %49 = vadd.xlane.f32.xlu0 %v46_v3 }
  0x82   :  { %v48_v4 = vpop.xlane.xlu0 %47 }
  0x83   :  { %v51_v5 = vmax.f32 %v48_v4, 1e-24 }
  0x85   :  { %110 = vrsqrt.f32 %v51_v5  ;;  %vm59_vm1 = vweird.f32 %v51_v5 }
  0x8a   :  { %v50_v6 = vpop.xlane.xlu0 %49 }
  0x8b   :  { %v111_v7 = vpop.eup %110  ;;  %v52_v8 = vmax.f32 %v50_v6, 1e-24 }
  0x8c   :  { %v54_v9 = vmul.f32 %v111_v7, %v51_v5  ;;  %vm60_vm0 = vweird.f32 %v111_v7 }
  0x8d   :  { %112 = vrsqrt.f32 %v52_v8  ;;  %vm61_vm2 = vmor %vm59_vm1, %vm60_vm0  ;;  %vm69_vm4 = vweird.f32 %v52_v8 }
  0x8e   :  { %v55_v10 = vmul.f32 %v111_v7, %v54_v9 }
  0x90   :  { %v56_v11 = vmul.f32 0.5, %v55_v10 }
  0x92   :  { %v57_v12 = vsub.f32 1.5, %v56_v11 }
  0x93   :  { %v113_v13 = vpop.eup %112 }
  0x94   :  { %v58_v14 = vmul.f32 %v111_v7, %v57_v12  ;;  %v64_v15 = vmul.f32 %v113_v13, %v52_v8  ;;  %vm70_vm3 = vweird.f32 %v113_v13 }
  0x95   :  { %vm71_vm5 = vmor %vm69_vm4, %vm70_vm3 }
  0x96   :  { %v62_v16 = vsel %vm61_vm2, %v111_v7, %v58_v14  ;;  %v65_v17 = vmul.f32 %v113_v13, %v64_v15 }
  0x97   :  { %v73_v18 = vmul.f32 5.656854, %v62_v16 }
  0x98   :  { %v66_v20 = vmul.f32 0.5, %v65_v17 }
  0x99   :  { %v75_v21 = vmul.f32 %v73_v18, %v42_v0 }
  0x9a   :  { %v67_v22 = vsub.f32 1.5, %v66_v20 }
  0x9b   :  { %v80_v23 = vmul.f32 %v109_v19, %v75_v21 }
  0x9c   :  { %v68_v24 = vmul.f32 %v113_v13, %v67_v22 }
  0x9d   :  { %82 = vst [vmem:[#allocation7] sm:$0xff] %v80_v23 }
  0x9e   :  { %v72_v25 = vsel %vm71_vm5, %v113_v13, %v68_v24 }
  0x9f   :  { %v74_v26 = vmul.f32 5.656854, %v72_v25 }
  0xa1   :  { %v76_v27 = vmul.f32 %v74_v26, %v43_v2 }
  0xa3   :  { %v81_v28 = vmul.f32 %v109_v19, %v76_v27 }
  0xa5   :  { %83 = vst [vmem:[#allocation7 + $0x8] sm:$0xff] %v81_v28 }
  0xa6   :  { %96 = dma.vmem_to_hbm [thread:$0]  %s89_s1, 256, %s91_s23, [#allocation4], %s193_s17, %s193_s17, %s194_s18  }
  0xa7   :  { %190 = dma.done.wait [#allocation4], 256  }
  0xa8   :  { %191 = vsyncadd [#allocation4], 4294967040 }
  0xa9   :  { %101 = vsyncpa [#allocation3], 1 }
  0xaa   :  { %102 = vsyncpa [#allocation6], 1 }
  0xab   :  { %103 = vsyncpa [#allocation4], 1 }

</bundles_post_ra>
